<compile_context>
chip_gen: v6e
topology: v6e:2x2x1
jax: 0.10.0
libtpu: 0.0.40
codegen_flags: <defaults>
</compile_context>

<pallas_src>
import numpy as np
import jax
import jax.numpy as jnp
from jax.experimental import pallas as pl
from jax.experimental.pallas import tpu as pltpu


def _round_up(x, m):
    return ((int(x) + m - 1) // m) * m


def _next_pow2(x):
    return 1 << (int(x) - 1).bit_length()


def _device_vmem_bytes():
    try:
        return int(pltpu.get_tpu_info().vmem_capacity_bytes)
    except Exception:
        return 64 << 20  # conservative: v7x per-TensorCore VMEM


def _working_set_bytes(hidden, tm, c_pad, in_bytes, compute_ce, emit_logits):
    """Full double-buffered pipeline footprint for one grid step."""
    small = 8 * tm * 4                               # (1, tm) tile padded to 8 sublanes
    per_step = hidden * tm * in_bytes + small        # x tile + argmax out tile
    if emit_logits:
        per_step += c_pad * tm * 4                   # f32 logits out tile
    if compute_ce:
        per_step += 2 * small                        # target in + ce out tiles
    w_block = c_pad * hidden * in_bytes              # weight block (double-buffered too)
    return 2 * per_step + 2 * w_block


def _choose_tile_m(max_group_rows, hidden, c_pad, in_bytes, compute_ce, emit_logits,
                   requested=None):
    if requested is not None:
        return max(128, _round_up(requested, 128))
    # Budget ~half the physical per-core VMEM (<= 64 MiB); leaves room for compiler
    # internal scratch on every generation (v7x: 32 MiB of 64; v5e/v6e: 64 of 128).
    budget = max(16 << 20, min(_device_vmem_bytes() // 2, 64 << 20))
    tm = 512
    while tm > 128 and _working_set_bytes(hidden, tm, c_pad, in_bytes,
                                          compute_ce, emit_logits) > budget:
        tm //= 2
    tm = min(tm, _round_up(max_group_rows, 128))
    return max(tm, 128)


def _vmem_limit_bytes(hidden, tm, c_pad, in_bytes, compute_ce, emit_logits):
    # Exact computed need + small headroom, never the full physical VMEM.
    need = _working_set_bytes(hidden, tm, c_pad, in_bytes, compute_ce, emit_logits)
    need += 4 << 20
    cap = _device_vmem_bytes() - (16 << 20)
    return int(max(16 << 20, min(need, cap)))


def _make_kernel(label_smoothing: float, compute_ce: bool, emit_logits: bool):
    ls = float(label_smoothing)

    def kernel(tile_group_ref, tile_card_ref, x_ref, w_ref, *rest):
        del tile_group_ref  # only consumed by the weight index_map
        r = 0
        if compute_ce:
            tgt_ref = rest[r]; r += 1
        out_refs = rest[r:]
        o = 0
        if emit_logits:
            logits_ref = out_refs[o]; o += 1
        if compute_ce:
            ce_ref = out_refs[o]; o += 1
        arg_ref = out_refs[o]

        i = pl.program_id(0)
        card = tile_card_ref[i]          # true #classes for this tile's group (SMEM)

        x = x_ref[...]                   # (H, tm)  positions on lanes (bf16 or f32)
        w = w_ref[...]                   # (C_pad, H)
        # 1x1 bias-free Conv1d == matmul over hidden dim on the MXU; f32 accumulate.
        logits = jnp.dot(w, x, preferred_element_type=jnp.float32)   # (C_pad, tm) f32
        if emit_logits:
            logits_ref[...] = logits.astype(logits_ref.dtype)

        c_pad = logits.shape[0]
        class_ids = jax.lax.broadcasted_iota(jnp.int32, logits.shape, 0)
        valid = class_ids < card
        masked = jnp.where(valid, logits, -jnp.inf)   # padded classes never win/contribute

        # argmax over the true classes (first occurrence of the max), pure int32 path
        m = jnp.max(masked, axis=0, keepdims=True)                      # (1, tm)
        is_max = masked == m
        arg = jnp.min(jnp.where(is_max, class_ids, jnp.int32(c_pad)),
                      axis=0, keepdims=True)
        arg_ref[...] = arg.astype(jnp.int32)

        if compute_ce:
            # cross entropy, reduction='none', optional label smoothing
            lse = m + jnp.log(jnp.sum(jnp.exp(masked - m), axis=0, keepdims=True))
            tgt = tgt_ref[...]                                           # (1, tm) int32
            picked = jnp.sum(jnp.where(class_ids == tgt, logits, 0.0),
                             axis=0, keepdims=True)
            nll = lse - picked
            if ls > 0.0:
                mean_logits = (jnp.sum(jnp.where(valid, logits, 0.0),
                                       axis=0, keepdims=True)
                               / card.astype(jnp.float32))               # TRUE cardinality
                ce = (1.0 - ls) * nll + ls * (lse - mean_logits)
            else:
                ce = nll
            ce_ref[...] = ce.astype(ce_ref.dtype)

    return kernel


def _fused_forward(tile_group, tile_card, x, w_packed, tgt, *,
                   tm, label_smoothing, compute_ce, emit_logits):
    hidden, m_pad = x.shape
    c_pad = w_packed.shape[1]
    num_tiles = m_pad // tm
    in_bytes = jnp.dtype(x.dtype).itemsize

    in_specs = [
        pl.BlockSpec((hidden, tm), lambda i, tg, tc: (0, i)),                  # x tile
        pl.BlockSpec((None, c_pad, hidden), lambda i, tg, tc: (tg[i], 0, 0)),  # group W
    ]
    args = [x, w_packed]
    if compute_ce:
        in_specs.append(pl.BlockSpec((1, tm), lambda i, tg, tc: (0, i)))       # targets
        args.append(tgt)

    out_shape, out_specs = [], []
    if emit_logits:
        out_shape.append(jax.ShapeDtypeStruct((c_pad, m_pad), jnp.float32))
        out_specs.append(pl.BlockSpec((c_pad, tm), lambda i, tg, tc: (0, i)))
    if compute_ce:
        out_shape.append(jax.ShapeDtypeStruct((1, m_pad), jnp.float32))
        out_specs.append(pl.BlockSpec((1, tm), lambda i, tg, tc: (0, i)))
    out_shape.append(jax.ShapeDtypeStruct((1, m_pad), jnp.int32))
    out_specs.append(pl.BlockSpec((1, tm), lambda i, tg, tc: (0, i)))

    grid_spec = pltpu.PrefetchScalarGridSpec(
        num_scalar_prefetch=2,                # tile_group, tile_card -> SMEM
        grid=(num_tiles,),
        in_specs=in_specs,
        out_specs=tuple(out_specs),
    )
    return pl.pallas_call(
        _make_kernel(label_smoothing, compute_ce, emit_logits),
        grid_spec=grid_spec,
        out_shape=tuple(out_shape),
        compiler_params=pltpu.CompilerParams(
            dimension_semantics=("parallel",),   # shards M tiles across v7x's 2 TCs
            vmem_limit_bytes=_vmem_limit_bytes(hidden, tm, c_pad, in_bytes,
                                               compute_ce, emit_logits)),
    )(tile_group, tile_card, *args)


class MultiCardinalCategoriesPallas:
    """JAX/Pallas port of MultiCardinalCategories (inference / loss path, dropout_p=0)."""

    def __init__(self, hidden_size, categorical_groups_bool_masks,
                 label_smoothing=0.0, seed=0, tile_m=None,
                 compute_dtype=jnp.bfloat16):
        self.hidden_size = int(hidden_size)
        self.label_smoothing = float(label_smoothing)
        self.tile_m = tile_m
        self.compute_dtype = jnp.dtype(compute_dtype)
        self.masks = {int(card): np.asarray(m, dtype=bool)
                      for card, m in categorical_groups_bool_masks.items()}
        self.cards = sorted(self.masks)
        self.group_idx = {c: np.nonzero(self.masks[c])[0] for c in self.cards}
        self.Lc = int(len(next(iter(self.masks.values()))))

        # Deterministic Conv1d(hidden, card, 1, bias=False) weights (f32 master copy).
        key = jax.random.PRNGKey(seed)
        bound = 1.0 / np.sqrt(self.hidden_size)
        self.weights = {}
        for card in self.cards:
            key, sub = jax.random.split(key)
            self.weights[card] = jax.random.uniform(
                sub, (card, self.hidden_size), jnp.float32, -bound, bound)

        # Bucket groups by padded cardinality so small-card groups don't pay for the
        # largest group's C_pad (wasted MXU flops + logits writeback).
        buckets = {}
        for card in self.cards:
            cp = max(8, _next_pow2(_round_up(card, 8)))
            buckets.setdefault(cp, []).append(card)
        self.buckets = dict(sorted(buckets.items()))

        # Host-side packing once per bucket: (G_b, C_pad_b, H), classes zero-padded,
        # stored in compute_dtype (bf16 by default -> faster MXU, half the DMA bytes).
        self.w_packed = {}
        for cp, cards_b in self.buckets.items():
            w = np.zeros((len(cards_b), cp, self.hidden_size), np.float32)
            for g, card in enumerate(cards_b):
                w[g, :card, :] = np.asarray(self.weights[card])
            self.w_packed[cp] = jnp.asarray(w, dtype=self.compute_dtype)

        self._fwd_cache = {}
        # TODO(synk): per-class cross-entropy weights (use_cross_entropy_weights=True,
        # training mode only) and dropout are not ported; default inference path uses neither.
        # TODO(synk): for very large cardinalities (C_pad >= ~2048) add a class-axis grid
        # dimension with online max/lse/argmax accumulators instead of one (C_pad, tm) tile.

    # ---- jitted end-to-end forward builders (pack -> pallas -> unpack fused) ----

    def _build_forward(self, compute_ce: bool, return_logits: bool):
        emit_logits = bool(return_logits)
        ls = self.label_smoothing
        hidden = self.hidden_size
        cdt = self.compute_dtype
        tile_m_req = self.tile_m

        def run(u_hidden, u_target=None):
            N, H, Lc = u_hidden.shape
            x_cast = u_hidden.astype(cdt)
            out_logits = {}
            out_ce = jnp.zeros((N, Lc), jnp.float32) if compute_ce else None
            sampled = jnp.zeros((N, Lc), jnp.int32)

            for c_pad, cards_b in self.buckets.items():
                groups = [(card, self.group_idx[card]) for card in cards_b
                          if self.group_idx[card].size > 0]
                if not groups:
                    continue
                in_bytes = jnp.dtype(cdt).itemsize
                max_rows = max(N * int(idx.size) for _, idx in groups)
                tm = _choose_tile_m(max_rows, hidden, c_pad, in_bytes,
                                    compute_ce, emit_logits, tile_m_req)

                # Pack this bucket's groups column-wise; each group padded to a tile
                # multiple so a tile never mixes groups (column order: n outer, l inner).
                x_chunks, t_chunks, tile_group, tile_card, layout = [], [], [], [], []
                col = 0
                for g, (card, idx) in enumerate(groups):
                    Lg = int(idx.size)
                    Mg = N * Lg
                    Mg_pad = _round_up(Mg, tm)
                    xg = jnp.transpose(x_cast[:, :, idx], (1, 0, 2)).reshape(H, Mg)
                    x_chunks.append(jnp.pad(xg, ((0, 0), (0, Mg_pad - Mg))))
                    if compute_ce:
                        tg = u_target[:, idx].astype(jnp.int32).reshape(1, Mg)
                        t_chunks.append(jnp.pad(tg, ((0, 0), (0, Mg_pad - Mg))))
                    n_tiles = Mg_pad // tm
                    tile_group += [g] * n_tiles
                    tile_card += [card] * n_tiles
                    layout.append((card, col, Mg, Lg, idx))
                    col += Mg_pad

                x_all = x_chunks[0] if len(x_chunks) == 1 else jnp.concatenate(x_chunks, 1)
                tgt_all = None
                if compute_ce:
                    tgt_all = (t_chunks[0] if len(t_chunks) == 1
                               else jnp.concatenate(t_chunks, 1))

                outs = _fused_forward(
                    jnp.asarray(tile_group, jnp.int32),
                    jnp.asarray(tile_card, jnp.int32),
                    x_all, self.w_packed[c_pad], tgt_all,
                    tm=tm, label_smoothing=ls,
                    compute_ce=compute_ce, emit_logits=emit_logits)

                o = 0
                if emit_logits:
                    logits_all = outs[o]; o += 1
                if compute_ce:
                    ce_all = outs[o]; o += 1
                arg_all = outs[o]

                # Unpack (padded classes / padded columns dropped).
                for card, start, Mg, Lg, idx in layout:
                    if emit_logits:
                        lg = logits_all[:card, start:start + Mg]
                        out_logits[card] = jnp.transpose(lg.reshape(card, N, Lg), (1, 0, 2))
                    sampled = sampled.at[:, idx].set(
                        arg_all[0, start:start + Mg].reshape(N, Lg))
                    if compute_ce:
                        out_ce = out_ce.at[:, idx].set(
                            ce_all[0, start:start + Mg].reshape(N, Lg))
            return out_logits, out_ce, sampled

        if compute_ce:
            return jax.jit(lambda uh, ut: run(uh, ut))
        return jax.jit(lambda uh: run(uh))

    def forward_full_sequence(self, u_hidden, u_target=None, sample_only=False,
                              return_logits=True):
        """u_hidden: (N, hidden, Lc); u_target: (N, Lc) int. Same semantics as torch.
        Set return_logits=False on the loss path to skip the full logits writeback."""
        N, H, Lc = u_hidden.shape
        assert H == self.hidden_size and Lc == self.Lc
        compute_ce = not sample_only
        if compute_ce and u_target is None:
            raise ValueError("u_target is required unless sample_only=True")

        key = (compute_ce, bool(return_logits))
        if key not in self._fwd_cache:
            self._fwd_cache[key] = self._build_forward(*key)
        fn = self._fwd_cache[key]
        if compute_ce:
            out_logits, out_ce, sampled = fn(u_hidden, jnp.asarray(u_target))
        else:
            out_logits, out_ce, sampled = fn(u_hidden)
        return out_logits, (out_ce if compute_ce else None), sampled


def _reference(model, u_hidden, u_target, label_smoothing=0.0):
    """Pure-JAX f32 reference for correctness checking."""
    N, H, Lc = u_hidden.shape
    out_ce = jnp.zeros((N, Lc), jnp.float32)
    sampled = jnp.zeros((N, Lc), jnp.int32)
    out_logits = {}
    for card, mask in model.masks.items():
        idx = np.nonzero(mask)[0]
        x_g = u_hidden[:, :, idx]                               # (N, H, Lg)
        logits = jnp.einsum('nhl,ch->ncl', x_g, model.weights[card])
        out_logits[card] = logits
        sampled = sampled.at[:, idx].set(jnp.argmax(logits, axis=1).astype(jnp.int32))
        logp = jax.nn.log_softmax(logits, axis=1)
        tgt = u_target[:, idx].astype(jnp.int32)
        nll = -jnp.take_along_axis(logp, tgt[:, None, :], axis=1)[:, 0, :]
        smooth = -jnp.mean(logp, axis=1)
        ce = (1.0 - label_smoothing) * nll + label_smoothing * smooth
        out_ce = out_ce.at[:, idx].set(ce)
    return out_logits, out_ce, sampled


if __name__ == "__main__":
    N, hidden, Lc = 2, 32, 8
    # Two cardinality groups: card=4 on even positions, card=8 on odd positions.
    mask4 = np.zeros(Lc, dtype=bool); mask4[0::2] = True
    mask8 = np.zeros(Lc, dtype=bool); mask8[1::2] = True
    groups = {4: mask4, 8: mask8}
    idx4, idx8 = np.nonzero(mask4)[0], np.nonzero(mask8)[0]

    key = jax.random.PRNGKey(0)
    k_x, k_t4, k_t8 = jax.random.split(key, 3)
    u_hidden = jax.random.normal(k_x, (N, hidden, Lc), jnp.float32)
    u_target = np.zeros((N, Lc), dtype=np.int32)
    u_target[:, mask4] = np.asarray(jax.random.randint(k_t4, (N, int(mask4.sum())), 0, 4))
    u_target[:, mask8] = np.asarray(jax.random.randint(k_t8, (N, int(mask8.sum())), 0, 8))
    u_target = jnp.asarray(u_target)

    # --- exact f32 path (bit-level check of masking / CE / argmax semantics) ---
    model_f32 = MultiCardinalCategoriesPallas(hidden, groups, label_smoothing=0.0,
                                              seed=0, compute_dtype=jnp.float32)
    out_logits, out_ce, sampled = model_f32.forward_full_sequence(u_hidden, u_target)
    jax.block_until_ready((out_logits, out_ce, sampled))
    ref_logits, ref_ce, ref_sampled = _reference(model_f32, u_hidden, u_target, 0.0)
    for card in groups:
        np.testing.assert_allclose(np.asarray(out_logits[card]),
                                   np.asarray(ref_logits[card]), rtol=1e-5, atol=1e-5)
    np.testing.assert_allclose(np.asarray(out_ce), np.asarray(ref_ce), rtol=1e-5, atol=1e-5)
    np.testing.assert_array_equal(np.asarray(sampled), np.asarray(ref_sampled))

    # --- label smoothing (f32) ---
    model_ls = MultiCardinalCategoriesPallas(hidden, groups, label_smoothing=0.1,
                                             seed=0, compute_dtype=jnp.float32)
    _, out_ce_ls, _ = model_ls.forward_full_sequence(u_hidden, u_target)
    jax.block_until_ready(out_ce_ls)
    _, ref_ce_ls, _ = _reference(model_ls, u_hidden, u_target, 0.1)
    np.testing.assert_allclose(np.asarray(out_ce_ls), np.asarray(ref_ce_ls),
                               rtol=1e-5, atol=1e-5)

    # --- sample_only path (CE math and target DMA skipped entirely) ---
    logits_s, ce_s, sampled_s = model_f32.forward_full_sequence(u_hidden, None,
                                                                sample_only=True)
    jax.block_until_ready((logits_s, sampled_s))
    assert ce_s is None
    np.testing.assert_array_equal(np.asarray(sampled_s), np.asarray(ref_sampled))

    # --- default bf16 MXU path (loose tolerance vs f32 reference) ---
    model_bf16 = MultiCardinalCategoriesPallas(hidden, groups, label_smoothing=0.0, seed=0)
    out_logits_b, out_ce_b, sampled_b = model_bf16.forward_full_sequence(u_hidden, u_target)
    jax.block_until_ready((out_logits_b, out_ce_b, sampled_b))
    for card in groups:
        np.testing.assert_allclose(np.asarray(out_logits_b[card]),
                                   np.asarray(ref_logits[card]), rtol=5e-2, atol=5e-2)
    np.testing.assert_allclose(np.asarray(out_ce_b), np.asarray(ref_ce),
                               rtol=5e-2, atol=5e-2)
    # argmax self-consistency against the kernel's own returned logits
    for card, idx in ((4, idx4), (8, idx8)):
        np.testing.assert_array_equal(
            np.asarray(sampled_b[:, idx]),
            np.asarray(jnp.argmax(out_logits_b[card], axis=1).astype(jnp.int32)))

    # --- loss-only path: skip the full logits writeback (biggest HBM saving) ---
    ol_none, ce_only, sampled_only = model_bf16.forward_full_sequence(
        u_hidden, u_target, return_logits=False)
    jax.block_until_ready((ce_only, sampled_only))
    assert len(ol_none) == 0
    np.testing.assert_allclose(np.asarray(ce_only), np.asarray(out_ce_b),
                               rtol=1e-6, atol=1e-6)
    np.testing.assert_array_equal(np.asarray(sampled_only), np.asarray(sampled_b))

    print("KERNEL_OK")
</pallas_src>

<mosaic_0001>
module attributes {stable_mosaic.version = 11 : i64} {
  func.func @kernel(%arg0: i32, %arg1: memref<2xi32, #tpu.memory_space<smem>>, %arg2: memref<2xi32, #tpu.memory_space<smem>>, %arg3: memref<32x128xf32, #tpu.memory_space<vmem>>, %arg4: memref<1x8x32xf32, #tpu.memory_space<vmem>>, %arg5: memref<1x128xi32, #tpu.memory_space<vmem>>, %arg6: memref<8x128xf32, #tpu.memory_space<vmem>>, %arg7: memref<1x128xf32, #tpu.memory_space<vmem>>, %arg8: memref<1x128xi32, #tpu.memory_space<vmem>>) attributes {dimension_semantics = [#tpu.dimension_semantics<parallel>], iteration_bounds = array<i64: 2>, scalar_prefetch = 2 : i64, scratch_operands = 0 : i64, tpu.core_type = #tpu.core_type<tc>, window_params = [{transform_indices = @transform_0, window_bounds = array<i64: 32, 128>}, {transform_indices = @transform_1, window_bounds = array<i64: 1, 8, 32>}, {transform_indices = @transform_2, window_bounds = array<i64: 1, 128>}, {transform_indices = @transform_3, window_bounds = array<i64: 8, 128>}, {transform_indices = @transform_4, window_bounds = array<i64: 1, 128>}, {transform_indices = @transform_5, window_bounds = array<i64: 1, 128>}]} {
    %0 = arith.index_cast %arg0 : i32 to index
    %1 = memref.load %arg2[%0] : memref<2xi32, #tpu.memory_space<smem>>
    %c0 = arith.constant 0 : index
    %c0_0 = arith.constant 0 : index
    %2 = vector.load %arg3[%c0, %c0_0] : memref<32x128xf32, #tpu.memory_space<vmem>>, vector<32x128xf32>
    %c0_1 = arith.constant 0 : index
    %c0_2 = arith.constant 0 : index
    %c0_3 = arith.constant 0 : index
    %3 = vector.load %arg4[%c0_1, %c0_2, %c0_3] : memref<1x8x32xf32, #tpu.memory_space<vmem>>, vector<1x8x32xf32>
    %4 = vector.shape_cast %3 : vector<1x8x32xf32> to vector<8x32xf32>
    %cst = arith.constant dense<0.000000e+00> : vector<8x128xf32>
    %5 = tpu.matmul %4, %2, %cst {dimension_numbers = #tpu.dot_dimension_numbers<[1], [0], [0], [1], [0, 0, 1, 1], [], []>} : vector<8x32xf32>, vector<32x128xf32>, vector<8x128xf32> -> vector<8x128xf32>
    %c0_4 = arith.constant 0 : index
    %c0_5 = arith.constant 0 : index
    %6 = vector.load %arg6[%c0_4, %c0_5] : memref<8x128xf32, #tpu.memory_space<vmem>>, vector<8x128xf32>
    tpu.vector_store %arg6[%c0_4, %c0_5], %5 {strides = array<i32>} : memref<8x128xf32, #tpu.memory_space<vmem>>, vector<8x128xf32>,
    %7 = tpu.iota {dimensions = array<i32: 0>} : vector<8x128xi32>
    %8 = vector.broadcast %1 : i32 to vector<8x128xi32>
    %9 = arith.cmpi slt, %7, %8 : vector<8x128xi32>
    %cst_6 = arith.constant 0xFF800000 : f32
    %10 = vector.broadcast %cst_6 : f32 to vector<8x128xf32>
    %11 = arith.select %9, %5, %10 : vector<8x128xi1>, vector<8x128xf32>
    %cst_7 = arith.constant dense<0xFF800000> : vector<128xf32>
    %12 = vector.multi_reduction <maximumf>, %11, %cst_7 [0] : vector<8x128xf32> to vector<128xf32>
    %13 = vector.shape_cast %12 : vector<128xf32> to vector<1x128xf32>
    %14 = vector.broadcast %13 : vector<1x128xf32> to vector<8x128xf32>
    %15 = arith.cmpf oeq, %11, %14 : vector<8x128xf32>
    %c8_i32 = arith.constant 8 : i32
    %16 = vector.broadcast %c8_i32 : i32 to vector<8x128xi32>
    %17 = arith.select %15, %7, %16 : vector<8x128xi1>, vector<8x128xi32>
    %cst_8 = arith.constant dense<2147483647> : vector<128xi32>
    %18 = vector.multi_reduction <minsi>, %17, %cst_8 [0] : vector<8x128xi32> to vector<128xi32>
    %19 = vector.shape_cast %18 : vector<128xi32> to vector<1x128xi32>
    %c0_9 = arith.constant 0 : index
    %c0_10 = arith.constant 0 : index
    %20 = vector.load %arg8[%c0_9, %c0_10] : memref<1x128xi32, #tpu.memory_space<vmem>>, vector<1x128xi32>
    tpu.vector_store %arg8[%c0_9, %c0_10], %19 {strides = array<i32>} : memref<1x128xi32, #tpu.memory_space<vmem>>, vector<1x128xi32>,
    %21 = vector.broadcast %13 : vector<1x128xf32> to vector<8x128xf32>
    %22 = arith.subf %11, %21 : vector<8x128xf32>
    %23 = math.exp %22 : vector<8x128xf32>
    %cst_11 = arith.constant dense<0.000000e+00> : vector<128xf32>
    %24 = vector.multi_reduction <add>, %23, %cst_11 [0] : vector<8x128xf32> to vector<128xf32>
    %25 = vector.shape_cast %24 : vector<128xf32> to vector<1x128xf32>
    %26 = math.log %25 : vector<1x128xf32>
    %27 = arith.addf %13, %26 : vector<1x128xf32>
    %c0_12 = arith.constant 0 : index
    %c0_13 = arith.constant 0 : index
    %28 = vector.load %arg5[%c0_12, %c0_13] : memref<1x128xi32, #tpu.memory_space<vmem>>, vector<1x128xi32>
    %29 = vector.broadcast %28 : vector<1x128xi32> to vector<8x128xi32>
    %30 = arith.cmpi eq, %7, %29 : vector<8x128xi32>
    %cst_14 = arith.constant 0.000000e+00 : f32
    %31 = vector.broadcast %cst_14 : f32 to vector<8x128xf32>
    %32 = arith.select %30, %5, %31 : vector<8x128xi1>, vector<8x128xf32>
    %cst_15 = arith.constant dense<0.000000e+00> : vector<128xf32>
    %33 = vector.multi_reduction <add>, %32, %cst_15 [0] : vector<8x128xf32> to vector<128xf32>
    %34 = vector.shape_cast %33 : vector<128xf32> to vector<1x128xf32>
    %35 = arith.subf %27, %34 : vector<1x128xf32>
    %c0_16 = arith.constant 0 : index
    %c0_17 = arith.constant 0 : index
    %36 = vector.load %arg7[%c0_16, %c0_17] : memref<1x128xf32, #tpu.memory_space<vmem>>, vector<1x128xf32>
    tpu.vector_store %arg7[%c0_16, %c0_17], %35 {strides = array<i32>} : memref<1x128xf32, #tpu.memory_space<vmem>>, vector<1x128xf32>,
    return
  }
  func.func @transform_0(%arg0: i32, %arg1: memref<2xi32, #tpu.memory_space<smem>>, %arg2: memref<2xi32, #tpu.memory_space<smem>>) -> (i32, i32) {
    %c0_i32 = arith.constant 0 : i32
    %c0_i32_0 = arith.constant 0 : i32
    return %c0_i32, %arg0 : i32, i32
  }
  func.func @transform_1(%arg0: i32, %arg1: memref<2xi32, #tpu.memory_space<smem>>, %arg2: memref<2xi32, #tpu.memory_space<smem>>) -> (i32, i32, i32) {
    %0 = arith.index_cast %arg0 : i32 to index
    %1 = memref.load %arg1[%0] : memref<2xi32, #tpu.memory_space<smem>>
    %c0_i32 = arith.constant 0 : i32
    %c0_i32_0 = arith.constant 0 : i32
    %c0_i32_1 = arith.constant 0 : i32
    return %1, %c0_i32, %c0_i32_0 : i32, i32, i32
  }
  func.func @transform_2(%arg0: i32, %arg1: memref<2xi32, #tpu.memory_space<smem>>, %arg2: memref<2xi32, #tpu.memory_space<smem>>) -> (i32, i32) {
    %c0_i32 = arith.constant 0 : i32
    %c0_i32_0 = arith.constant 0 : i32
    return %c0_i32, %arg0 : i32, i32
  }
  func.func @transform_3(%arg0: i32, %arg1: memref<2xi32, #tpu.memory_space<smem>>, %arg2: memref<2xi32, #tpu.memory_space<smem>>) -> (i32, i32) {
    %c0_i32 = arith.constant 0 : i32
    %c0_i32_0 = arith.constant 0 : i32
    return %c0_i32, %arg0 : i32, i32
  }
  func.func @transform_4(%arg0: i32, %arg1: memref<2xi32, #tpu.memory_space<smem>>, %arg2: memref<2xi32, #tpu.memory_space<smem>>) -> (i32, i32) {
    %c0_i32 = arith.constant 0 : i32
    %c0_i32_0 = arith.constant 0 : i32
    return %c0_i32, %arg0 : i32, i32
  }
  func.func @transform_5(%arg0: i32, %arg1: memref<2xi32, #tpu.memory_space<smem>>, %arg2: memref<2xi32, #tpu.memory_space<smem>>) -> (i32, i32) {
    %c0_i32 = arith.constant 0 : i32
    %c0_i32_0 = arith.constant 0 : i32
    return %c0_i32, %arg0 : i32, i32
  }
}

</mosaic_0001>

<bundles_post_ra>
// kernel: _lambda_.1
= control target key start
LH: loop header
LB: loop body
LE: loop exit
PB: predicated region body
PF: predicated region fallthrough
CT: control target
= control target key end

     0   :  { %s834_s0 = inlined_call_operand.vmem [shape: s32[2], index: 0, kind: input, shape index: {}]   ;;  %s835_s2 = inlined_call_operand.vmem [shape: f32[32,256], index: 2, kind: input, shape index: {}]   ;;  %s836_s3 = inlined_call_operand.vmem [shape: f32[2,8,32], index: 3, kind: input, shape index: {}]   ;;  %s837_s4 = inlined_call_operand.vmem [shape: s32[1,256], index: 4, kind: input, shape index: {}]   ;;  %s838_s5 = inlined_call_operand.vmem [shape: f32[8,256], index: 5, kind: output, shape index: {0}]   ;;  %s839_s6 = inlined_call_operand.vmem [shape: f32[1,256], index: 6, kind: output, shape index: {1}]   ;;  %s840_s7 = inlined_call_operand.vmem [shape: s32[1,256], index: 7, kind: output, shape index: {2}]   ;;  %s841_s1 = inlined_call_operand.vmem [shape: s32[2], index: 1, kind: input, shape index: {}]  }
   0x1   :  { %s13_s26 = sshll.u32 %s834_s0, 4  ;;  %s17_s29 = sshll.u32 %s841_s1, 4  ;;  %s14_s26 = int_to_ptr.vmem [resolvable:$true] %s13_s26  ;;  %s18_s29 = int_to_ptr.vmem [resolvable:$true] %s17_s29 }
   0x2   :  { %s660_s30 = scalar_lea.vmem %s14_s26, 16  ;;  %p665_p1 = scmp.lt.s32.totalorder %s14_s26, %s14_s26 }
   0x3   :  { %p661_p0 = scmp.ne.s32.totalorder %s14_s26, %s660_s30  ;;  %p666_p2 = scmp.lt.s32.totalorder %s660_s30, %s660_s30 }
   0x5   :  { %p667_p3 = por %p666_p2, %p665_p1 }
   0x7   :  { %p668_p4 = pnand %p667_p3, %p661_p0 }
   0x9   :  { %671 = shalt.err (!%p668_p4)  }
   0xa   :  { %s710_s8 = smov [#allocation3]   ;;  %s672_s9 = scalar_lea.vmem %s18_s29, 16 }
   0xb   :  { %16 = dma.vmem_to_smem %s14_s26, 16, %s710_s8, [#allocation2] }
   0xc   :  { %p673_p5 = scmp.ne.s32.totalorder %s18_s29, %s672_s9  ;;  %p677_p6 = scmp.lt.s32.totalorder %s18_s29, %s18_s29 }
   0xd   :  { %p678_p7 = scmp.lt.s32.totalorder %s672_s9, %s672_s9 }
   0xf   :  { %p679_p8 = por %p678_p7, %p677_p6 }
  0x11   :  { %p680_p9 = pnand %p679_p8, %p673_p5 }
  0x13   :  { %683 = shalt.err (!%p680_p9)  }
  0x14   :  { %s711_s0 = smov [#allocation4]  }
  0x15   :  { %20 = dma.vmem_to_smem %s18_s29, 16, %s711_s0, [#allocation2] }
  0x16   :  { %696 = dma.done.wait [#allocation2], 32 }
  0x17   :  { %697 = vsyncadd [#allocation2], 4294967264 }
  0x18   :  { %22 = sfence }
  0x19   :  { %s760_s1 = smov 0   ;;  %s762_s10 = smov 0  }
  0x1a   :  { %s764_s11 = smov 0  }
  0x1b LB: > { %s776_s12 = sadd.s32 4294967295, %s708_s11   ;;  %s779_s13 = sadd.s32 1, %s708_s11   ;;  %s708_s11 = sphi %s764_s11, %s844_s11   ;;  %s704_s10 = sphi %s762_s10, %s843_s10   ;;  %s700_s1 = sphi %s760_s1, %s842_s1  }
  0x1c   : > { %s32_s14 = ssub.s32 %s708_s11, %s779_s13  ;;  %s35_s15 = sadd.s32 1, %s704_s10 }
  0x1d   : > { %p33_p10 = scmp.eq.s32.totalorder %s32_s14, 0  ;;  %p42_p11 = scmp.ne.s32.totalorder %s704_s10, %s700_s1 }
  0x1e   : > { %p43_p12 = scmp.eq.s32.totalorder %s708_s11, 0  ;;  %p601_p0 = scmp.ge.s32.totalorder %s708_s11, 2 }
  0x1f   : > { %s788_s16 = scalar_select %p33_p10, %s704_s10, %s35_s15  }
  0x20   : > { %p44_p13 = por %p43_p12, %p42_p11  ;;  %200 = sbr.rel (%p601_p0) target bundleno = 43 (0x2b), region = 16 }
  0x25   : > { %203 = sbr.rel (!%p44_p13) target bundleno = 43 (0x2b), region = 20  ;;  %s205_s17 = sand.u32 (%p44_p13), 1, %s704_s10  }
  0x26   : > { %s603_s18 = sshll.u32 (%p44_p13), %s708_s11, 3  ;;  %s602_s19 = sshll.u32 (%p44_p13), %s205_s17, 5 }
  0x27   : > { %s209_s22 = scalar_lea.vmem (%p44_p13), %s835_s2, %s603_s18  ;;  %s207_s23 = scalar_lea.vmem (%p44_p13), [#allocation5], %s602_s19 }
  0x28   : > { %v244_v0 = vld [vmem:[%s209_s22] sm:$0xff] (%p44_p13)  ;;  %v246_v1 = vld [vmem:[%s209_s22 + $0x10] sm:$0xff] (%p44_p13) }
  0x29   : > { %v248_v2 = vld [vmem:[%s209_s22 + $0x20] sm:$0xff] (%p44_p13)  ;;  %245 = vst [vmem:[%s207_s23] sm:$0xff] (%p44_p13), %v244_v0  ;;  %247 = vst [vmem:[%s207_s23 + $0x8] sm:$0xff] (%p44_p13), %v246_v1  ;;  %v250_v3 = vld [vmem:[%s209_s22 + $0x30] sm:$0xff] (%p44_p13) }
  0x2a   : > { %249 = vst [vmem:[%s207_s23 + $0x10] sm:$0xff] %v248_v2  ;;  %251 = vst [vmem:[%s207_s23 + $0x18] sm:$0xff] %v250_v3 }
  0x2b PF: > { %p604_p1 = scmp.ge.s32.totalorder %s708_s11, 1  ;;  %p271_p2 = scmp.lt.s32.totalorder %s708_s11, 3 }
  0x2d   : > { %p272_p3 = pnand %p604_p1, %p271_p2 }
  0x2e   : > { %s278_s24 = sand.u32 (!%p272_p3), 1, %s700_s1   ;;  %s318_s25 = sld [smem:[#allocation3 + %s776_s12]] (!%p272_p3) }
  0x2f   : > { %275 = sbr.rel (%p272_p3) target bundleno = 318 (0x13e), region = 66  ;;  %s605_s26 = sshll.u32 (!%p272_p3), %s278_s24, 5 }
  0x30   : > { %s280_s27 = scalar_lea.vmem (!%p272_p3), [#allocation5], %s605_s26  ;;  %p324_p5 = scmp.lt.s32.totalorder (!%p272_p3), %s776_s12, 1 }
  0x31   : > { %s337_s9 = sld [smem:[#allocation4 + %s776_s12]] (!%p272_p3) }
  0x34   : > { %v712_v4 = vmov 0.0   ;;  %vm713_vm0 = vmmov 0   ;;  %v341_v5 = vld [vmem:[%s280_s27 + $0x18] sm:$0xff]  ;;  %v340_v6 = vld [vmem:[%s280_s27 + $0x10] sm:$0xff]  ;;  %v339_v7 = vld [vmem:[%s280_s27 + $0x8] sm:$0xff]  ;;  %p319_p4 = scmp.lt.s32.totalorder %s318_s25, 1  ;;  %v418_v10 = vlaneseq }
  0x35   : > { %617 = vmatprep.subr.mxu0 %v712_v4  ;;  %625 = vmatprep.mubr.msk.f32.mxu0 %vm713_vm0, %v712_v4  ;;  %v338_v8 = vld [vmem:[%s280_s27] sm:$0xff]  ;;  %vm343_vm1 = vcmask 261120   ;;  %s848_s12 = smov (!%p324_p5, %s776_s12), 1 }
  0x36   : > { %618 = vmatpush3.msra.mxu0 %v341_v5  ;;  %s846_s25 = smov (!%p319_p4, %s318_s25), 1  ;;  %v419_v11 = vshrl.u32 %v418_v10, 7  ;;  %s607_s0 = sshll.u32 %s848_s12, 3 }
  0x37   : > { %619 = vmatprep.subr.mxu0 %v712_v4  ;;  %s606_s28 = sshll.u32 %s846_s25, 3  ;;  %v420_v12 = vstv %s337_s9  ;;  %s330_s14 = scalar_lea.vmem %s838_s5, %s607_s0 }
  0x38   : > { %620 = vmatpush3.msra.mxu0 %v340_v6  ;;  %s322_s8 = scalar_lea.vmem %s836_s3, %s606_s28  ;;  %vm421_vm2 = vcmp.lt.s32.totalorder %v419_v11, %v420_v12  ;;  %s336_s18 = scalar_lea.vmem %s840_s7, %s848_s12 }
  0x39   : > { %621 = vmatprep.subr.mxu0 %v712_v4  ;;  %v342_v9 = vld [vmem:[%s322_s8] sm:$0xff]  ;;  %s326_s21 = scalar_lea.vmem %s837_s4, %s848_s12  ;;  %s333_s24 = scalar_lea.vmem %s839_s6, %s848_s12 }
  0x3a   : > { %622 = vmatpush3.msra.mxu0 %v339_v7  ;;  %v609_v32 = vld [vmem:[%s326_s21] ss:$0 sm:$0xff] }
  0x3b   : > { %623 = vmatprep.subr.mxu0 %v712_v4  ;;  %vm458_vm7 = vcmp.eq.s32.totalorder %v419_v11, %v609_v32 }
  0x3c   : > { %624 = vmatpush3.msra.mxu0 %v338_v8 }
  0x3d   : > { %626 = vmatmul.mubr.msk.f32.vlgmr.msra.gmra.mxu0 %vm343_vm1, %v342_v9 }
  0xfd   : > { %v413_v13 = vpop.f32.mrf.mxu0 }
  0xfe   : > { %417 = vst [vmem:[%s330_s14] sm:$0xff] %v413_v13  ;;  %v422_v14 = vsel %vm421_vm2, %v413_v13, -inf  ;;  %v459_v36 = vsel %vm458_vm7, %v413_v13, 0.0 }
  0xff   : > { %v423_v15 = vrot.slane %v422_v14, 4  ;;  %v627_v16 = vpop.f32.mrf.mxu0  ;;  %v460_v39 = vrot.slane %v459_v36, 4 }
 0x101   : > { %v424_v17 = vmax.f32 %v422_v14, %v423_v15  ;;  %v461_v41 = vadd.f32 %v460_v39, %v459_v36 }
 0x103   : > { %v425_v18 = vrot.slane %v424_v17, 2  ;;  %v462_v42 = vrot.slane %v461_v41, 2 }
 0x105   : > { %v426_v19 = vmax.f32 %v424_v17, %v425_v18  ;;  %v463_v43 = vadd.f32 %v462_v42, %v461_v41 }
 0x107   : > { %v427_v20 = vrot.slane %v426_v19, 1  ;;  %v464_v44 = vrot.slane %v463_v43, 1 }
 0x109   : > { %v428_v21 = vmax.f32 %v426_v19, %v427_v20  ;;  %v465_v48 = vadd.f32 %v464_v44, %v463_v43 }
 0x10b   : > { %vm429_vm3 = vcmp.eq.f32.partialorder %v422_v14, %v428_v21  ;;  %v441_v22 = vsub.f32 %v422_v14, %v428_v21 }
 0x10c   : > { %v430_v23 = vsel %vm429_vm3, %v419_v11, 8 }
 0x10d   : > { %v431_v24 = vrot.slane %v430_v23, 4  ;;  %v442_v25 = vmul.f32 1.442695, %v441_v22 }
 0x10f   : > { %vm432_vm4 = vcmp.lt.s32.totalorder %v430_v23, %v431_v24  ;;  %656 = vpow2.f32 %v442_v25 }
 0x110   : > { %v433_v26 = vsel %vm432_vm4, %v430_v23, %v431_v24 }
 0x111   : > { %v434_v27 = vrot.slane %v433_v26, 2 }
 0x113   : > { %vm435_vm5 = vcmp.lt.s32.totalorder %v433_v26, %v434_v27 }
 0x114   : > { %v436_v28 = vsel %vm435_vm5, %v433_v26, %v434_v27 }
 0x115   : > { %v437_v29 = vrot.slane %v436_v28, 1 }
 0x117   : > { %vm438_vm6 = vcmp.lt.s32.totalorder %v436_v28, %v437_v29 }
 0x118   : > { %v439_v30 = vsel %vm438_vm6, %v436_v28, %v437_v29 }
 0x119   : > { %440 = vst [vmem:[%s336_s18] sm:$0x1] %v439_v30 }
 0x11c   : > { %v657_v31 = vpop.eup %656 }
 0x11d   : > { %v444_v33 = vrot.slane %v657_v31, 4 }
 0x11f   : > { %v445_v34 = vadd.f32 %v657_v31, %v444_v33 }
 0x121   : > { %v446_v35 = vrot.slane %v445_v34, 2 }
 0x123   : > { %v447_v37 = vadd.f32 %v446_v35, %v445_v34 }
 0x125   : > { %v448_v38 = vrot.slane %v447_v37, 1 }
 0x127   : > { %v449_v40 = vadd.f32 %v448_v38, %v447_v37 }
 0x129   : > { %658 = vlog2.f32 %v449_v40 }
 0x136   : > { %v659_v45 = vpop.eup %658 }
 0x137   : > { %v451_v46 = vmul.f32 0.6931472, %v659_v45 }
 0x139   : > { %v452_v47 = vadd.f32 %v451_v46, %v428_v21 }
 0x13b   : > { %v466_v49 = vsub.f32 %v452_v47, %v465_v48 }
 0x13d   : > { %467 = vst [vmem:[%s333_s24] sm:$0x1] %v466_v49 }
 0x13e PF: > { %p25_p6 = scmp.ge.s32.totalorder %s779_s13, 4   ;;  %s842_s1 = smov %s704_s10 }
 0x13f   : > { %s843_s10 = smov %s788_s16  ;;  %s844_s11 = smov %s779_s13 }
 0x140   :  { %27 = sbr.rel (!%p25_p6) target bundleno = 27 (0x1b), region = 135 }

</bundles_post_ra>
